<compile_context>
chip_gen: v5e
topology: v5e:2x2
jax: 0.10.0
libtpu: 0.0.40
codegen_flags: <defaults>
</compile_context>

<pallas_src>
import jax
import jax.numpy as jnp
from jax.experimental import pallas as pl
from jax.experimental.pallas import tpu as pltpu


C_IN = 16
C_OUT = 3
_LANE = 128


def _decoder_kernel(x_ref, w_ref, b_ref, o_ref):
    # x_ref: (1, C_IN, tn)   w_ref: (C_IN, C_OUT) pre-scaled by 0.5
    # b_ref: (C_OUT, 1) pre-scaled by 0.5        o_ref: (1, C_OUT, tn)
    x = x_ref[0].astype(jnp.float32)              # (16, tn), channels on sublanes
    w = w_ref[...]                                # (16, 3)

    rows = []
    for o in range(C_OUT):                        # unrolled: 3 x 16 VPU MACs
        p = x * w[:, o:o + 1]                     # (16, tn)  VALU
        p = p[:8, :] + p[8:, :]                   # (8, tn)   cross-vreg VALU fold
        rows.append(jnp.sum(p, axis=0, keepdims=True))   # (1, tn) 8-sublane reduce
    y = jnp.concatenate(rows, axis=0) + b_ref[...]       # (3, tn)

    # y == 0.5 * (W x + b); relu commutes with the positive 0.5 scale, so
    # sigmoid(relu(Wx + b)) == 0.5 * tanh(relu(y)) + 0.5   (tanh on the EUP).
    y = jnp.maximum(y, 0.0)
    o_ref[0] = (0.5 * jnp.tanh(y) + 0.5).astype(o_ref.dtype)


def _choose_pixel_tile(hw, n, max_tile):
    """Pick a lane-dense pixel tile tn (multiple of 128) and #pixel tiles."""
    chunks = pl.cdiv(hw, _LANE)                   # 128-lane chunks covering H*W
    tiles = pl.cdiv(hw, max_tile)                 # tiles needed to respect max_tile
    # v7x has 2 TensorCores: keep >= 4 total grid steps when enough pixels exist.
    min_steps = 4
    if n * tiles < min_steps:
        tiles = min(chunks, pl.cdiv(min_steps, max(n, 1)))
    tn = pl.cdiv(chunks, tiles) * _LANE
    if tn >= hw:                                  # tiny spatial extent: one full tile
        return hw, 1
    return tn, pl.cdiv(hw, tn)


def decoder_forward(x_nchw, weight, bias, *, max_tile=32768):
    """x_nchw: (N, 16, H, W).  weight: (3, 16, 1, 1).  bias: (3,)."""
    n, c, h, w = x_nchw.shape
    assert c == C_IN
    hw = h * w

    # Channels-on-sublane layout: (N, C_IN, H*W) -- free reshape, no transpose,
    # no padding copy (ragged last tile handled by Pallas block masking).
    x_view = x_nchw.reshape(n, C_IN, hw)
    tn, grid_p = _choose_pixel_tile(hw, n, max_tile)

    # Fold the two 0.5 factors of the sigmoid-tanh identity into the params.
    w_t = 0.5 * weight.reshape(C_OUT, C_IN).T.astype(jnp.float32)   # (C_IN, C_OUT)
    b_col = 0.5 * bias.reshape(C_OUT, 1).astype(jnp.float32)        # (C_OUT, 1)

    itemsize = jnp.dtype(x_nchw.dtype).itemsize
    cost = pl.CostEstimate(
        flops=2 * C_IN * C_OUT * n * hw,
        transcendentals=C_OUT * n * hw,
        bytes_accessed=(C_IN * itemsize + C_OUT * itemsize) * n * hw
        + (C_IN * C_OUT + C_OUT) * 4,
    )

    out_flat = pl.pallas_call(
        _decoder_kernel,
        out_shape=jax.ShapeDtypeStruct((n, C_OUT, hw), x_nchw.dtype),
        grid_spec=pltpu.PrefetchScalarGridSpec(
            num_scalar_prefetch=0,
            grid=(n, grid_p),
            in_specs=[
                pl.BlockSpec((1, C_IN, tn), lambda b, p: (b, 0, p)),
                pl.BlockSpec((C_IN, C_OUT), lambda b, p: (0, 0)),   # resident weight
                pl.BlockSpec((C_OUT, 1), lambda b, p: (0, 0)),      # resident bias
            ],
            out_specs=pl.BlockSpec((1, C_OUT, tn), lambda b, p: (b, 0, p)),
        ),
        compiler_params=pltpu.CompilerParams(
            dimension_semantics=("parallel", "parallel")),
        cost_estimate=cost,
    )(x_view, w_t, b_col)

    return out_flat.reshape(n, C_OUT, h, w)   # free reshape back to NCHW


if __name__ == "__main__":
    key = jax.random.PRNGKey(0)
    kx, kw, kb = jax.random.split(key, 3)

    # Small shapes consistent with the module: batch=2, C_in=16, spatial=16x16.
    x = jax.random.normal(kx, (2, C_IN, 16, 16), dtype=jnp.float32)

    # Deterministic synthetic Conv2d(16, 3, 1, 1) parameters.
    weight = jax.random.normal(kw, (C_OUT, C_IN, 1, 1), dtype=jnp.float32) * 0.1
    bias = jax.random.normal(kb, (C_OUT,), dtype=jnp.float32) * 0.1

    out = decoder_forward(x, weight, bias)
    jax.block_until_ready(out)

    # Pure-JAX reference for a sanity check of the kernel semantics.
    ref = jnp.einsum("nchw,oc->nohw", x, weight.reshape(C_OUT, C_IN))
    ref = ref + bias.reshape(1, C_OUT, 1, 1)
    ref = jax.nn.sigmoid(jnp.maximum(ref, 0.0))
    assert out.shape == (2, C_OUT, 16, 16)
    assert jnp.allclose(out, ref, atol=1e-5, rtol=1e-5)

    print("KERNEL_OK")
</pallas_src>

<mosaic_0001>
module attributes {stable_mosaic.version = 11 : i64} {
  func.func @_decoder_kernel(%arg0: i32, %arg1: i32, %arg2: memref<1x16x128xf32, #tpu.memory_space<vmem>>, %arg3: memref<16x3xf32, #tpu.memory_space<vmem>>, %arg4: memref<3x1xf32, #tpu.memory_space<vmem>>, %arg5: memref<1x3x128xf32, #tpu.memory_space<vmem>>) attributes {dimension_semantics = [#tpu.dimension_semantics<parallel>, #tpu.dimension_semantics<parallel>], iteration_bounds = array<i64: 2, 2>, scalar_prefetch = 0 : i64, scratch_operands = 0 : i64, tpu.core_type = #tpu.core_type<tc>, window_params = [{transform_indices = @transform_0, window_bounds = array<i64: 1, 16, 128>}, {pipeline_mode = #tpu.pipeline_mode<synchronous>, transform_indices = @transform_1, window_bounds = array<i64: 16, 3>}, {pipeline_mode = #tpu.pipeline_mode<synchronous>, transform_indices = @transform_2, window_bounds = array<i64: 3, 1>}, {transform_indices = @transform_3, window_bounds = array<i64: 1, 3, 128>}]} {
    %c0 = arith.constant 0 : index
    %c0_0 = arith.constant 0 : index
    %c0_1 = arith.constant 0 : index
    %0 = vector.load %arg2[%c0, %c0_0, %c0_1] : memref<1x16x128xf32, #tpu.memory_space<vmem>>, vector<1x16x128xf32>
    %1 = vector.shape_cast %0 : vector<1x16x128xf32> to vector<16x128xf32>
    %c0_2 = arith.constant 0 : index
    %c0_3 = arith.constant 0 : index
    %2 = vector.load %arg3[%c0_2, %c0_3] : memref<16x3xf32, #tpu.memory_space<vmem>>, vector<16x3xf32>
    %3 = vector.extract_strided_slice %2 {offsets = [0, 0], sizes = [16, 1], strides = [1, 1]} : vector<16x3xf32> to vector<16x1xf32>
    %4 = vector.broadcast %3 : vector<16x1xf32> to vector<16x128xf32>
    %5 = arith.mulf %1, %4 : vector<16x128xf32>
    %6 = vector.extract_strided_slice %5 {offsets = [0, 0], sizes = [8, 128], strides = [1, 1]} : vector<16x128xf32> to vector<8x128xf32>
    %7 = vector.extract_strided_slice %5 {offsets = [8, 0], sizes = [8, 128], strides = [1, 1]} : vector<16x128xf32> to vector<8x128xf32>
    %8 = arith.addf %6, %7 : vector<8x128xf32>
    %cst = arith.constant dense<0.000000e+00> : vector<128xf32>
    %9 = vector.multi_reduction <add>, %8, %cst [0] : vector<8x128xf32> to vector<128xf32>
    %10 = vector.shape_cast %9 : vector<128xf32> to vector<1x128xf32>
    %11 = vector.extract_strided_slice %2 {offsets = [0, 1], sizes = [16, 1], strides = [1, 1]} : vector<16x3xf32> to vector<16x1xf32>
    %12 = vector.broadcast %11 : vector<16x1xf32> to vector<16x128xf32>
    %13 = arith.mulf %1, %12 : vector<16x128xf32>
    %14 = vector.extract_strided_slice %13 {offsets = [0, 0], sizes = [8, 128], strides = [1, 1]} : vector<16x128xf32> to vector<8x128xf32>
    %15 = vector.extract_strided_slice %13 {offsets = [8, 0], sizes = [8, 128], strides = [1, 1]} : vector<16x128xf32> to vector<8x128xf32>
    %16 = arith.addf %14, %15 : vector<8x128xf32>
    %cst_4 = arith.constant dense<0.000000e+00> : vector<128xf32>
    %17 = vector.multi_reduction <add>, %16, %cst_4 [0] : vector<8x128xf32> to vector<128xf32>
    %18 = vector.shape_cast %17 : vector<128xf32> to vector<1x128xf32>
    %19 = vector.extract_strided_slice %2 {offsets = [0, 2], sizes = [16, 1], strides = [1, 1]} : vector<16x3xf32> to vector<16x1xf32>
    %20 = vector.broadcast %19 : vector<16x1xf32> to vector<16x128xf32>
    %21 = arith.mulf %1, %20 : vector<16x128xf32>
    %22 = vector.extract_strided_slice %21 {offsets = [0, 0], sizes = [8, 128], strides = [1, 1]} : vector<16x128xf32> to vector<8x128xf32>
    %23 = vector.extract_strided_slice %21 {offsets = [8, 0], sizes = [8, 128], strides = [1, 1]} : vector<16x128xf32> to vector<8x128xf32>
    %24 = arith.addf %22, %23 : vector<8x128xf32>
    %cst_5 = arith.constant dense<0.000000e+00> : vector<128xf32>
    %25 = vector.multi_reduction <add>, %24, %cst_5 [0] : vector<8x128xf32> to vector<128xf32>
    %26 = vector.shape_cast %25 : vector<128xf32> to vector<1x128xf32>
    %27 = tpu.concatenate %10, %18, %26 in 0 : vector<1x128xf32>, vector<1x128xf32>, vector<1x128xf32> -> vector<3x128xf32>
    %c0_6 = arith.constant 0 : index
    %c0_7 = arith.constant 0 : index
    %28 = vector.load %arg4[%c0_6, %c0_7] : memref<3x1xf32, #tpu.memory_space<vmem>>, vector<3x1xf32>
    %29 = vector.broadcast %28 : vector<3x1xf32> to vector<3x128xf32>
    %30 = arith.addf %27, %29 : vector<3x128xf32>
    %cst_8 = arith.constant 0.000000e+00 : f32
    %31 = vector.broadcast %cst_8 : f32 to vector<3x128xf32>
    %32 = arith.maximumf %30, %31 : vector<3x128xf32>
    %33 = math.tanh %32 : vector<3x128xf32>
    %cst_9 = arith.constant 5.000000e-01 : f32
    %34 = vector.broadcast %cst_9 : f32 to vector<3x128xf32>
    %35 = arith.mulf %34, %33 : vector<3x128xf32>
    %cst_10 = arith.constant 5.000000e-01 : f32
    %36 = vector.broadcast %cst_10 : f32 to vector<3x128xf32>
    %37 = arith.addf %35, %36 : vector<3x128xf32>
    %c0_11 = arith.constant 0 : index
    %c0_12 = arith.constant 0 : index
    %c0_13 = arith.constant 0 : index
    %38 = vector.load %arg5[%c0_11, %c0_12, %c0_13] : memref<1x3x128xf32, #tpu.memory_space<vmem>>, vector<1x3x128xf32>
    %39 = vector.shape_cast %38 : vector<1x3x128xf32> to vector<3x128xf32>
    %40 = vector.shape_cast %37 : vector<3x128xf32> to vector<1x3x128xf32>
    tpu.vector_store %arg5[%c0_11, %c0_12, %c0_13], %40 {strides = array<i32>} : memref<1x3x128xf32, #tpu.memory_space<vmem>>, vector<1x3x128xf32>,
    return
  }
  func.func @transform_0(%arg0: i32, %arg1: i32) -> (i32, i32, i32) {
    %c0_i32 = arith.constant 0 : i32
    %c0_i32_0 = arith.constant 0 : i32
    return %arg0, %c0_i32, %arg1 : i32, i32, i32
  }
  func.func @transform_1(%arg0: i32, %arg1: i32) -> (i32, i32) {
    %c0_i32 = arith.constant 0 : i32
    %c0_i32_0 = arith.constant 0 : i32
    %c0_i32_1 = arith.constant 0 : i32
    return %c0_i32, %c0_i32_0 : i32, i32
  }
  func.func @transform_2(%arg0: i32, %arg1: i32) -> (i32, i32) {
    %c0_i32 = arith.constant 0 : i32
    %c0_i32_0 = arith.constant 0 : i32
    %c0_i32_1 = arith.constant 0 : i32
    return %c0_i32, %c0_i32_0 : i32, i32
  }
  func.func @transform_3(%arg0: i32, %arg1: i32) -> (i32, i32, i32) {
    %c0_i32 = arith.constant 0 : i32
    %c0_i32_0 = arith.constant 0 : i32
    return %arg0, %c0_i32, %arg1 : i32, i32, i32
  }
}

</mosaic_0001>

<bundles_post_ra>
// kernel: tpu_custom_call.1
= control target key start
LH: loop header
LB: loop body
LE: loop exit
PB: predicated region body
PF: predicated region fallthrough
CT: control target
= control target key end

     0   :  { %8 = vsyncpa [#allocation3], 0  ;;  %s726_s0 = inlined_call_operand.hbm [shape: f32[2,16,256], index: 0, kind: input, shape index: {}]   ;;  %s727_s1 = inlined_call_operand.vmem [shape: f32[16,3], index: 1, kind: input, shape index: {}]   ;;  %s728_s2 = inlined_call_operand.vmem [shape: f32[3,1], index: 2, kind: input, shape index: {}]   ;;  %s729_s3 = inlined_call_operand.vmem [shape: f32[2,3,256], index: 3, kind: output, shape index: {}]  }
   0x1   :  { %10 = vsyncpa [#allocation3 + $0x1], 0  ;;  %s602_s12 = smov 0   ;;  %s604_s13 = smov 0  }
   0x2   :  { %s606_s14 = smov 0   ;;  %s608_s15 = smov 0  }
   0x3   :  { %s610_s16 = smov 0   ;;  %s612_s17 = smov 0  }
   0x4   :  { %s614_s18 = smov 0   ;;  %s616_s19 = smov 0  }
   0x5 LB: > { %s383_s20 = sadd.s32 4294967295, %s574_s19   ;;  %s25_s21 = sadd.s32 1, %s566_s17  ;;  %s574_s19 = sphi %s616_s19, %s16_s19   ;;  %s570_s18 = sphi %s614_s18, %s738_s18   ;;  %s566_s17 = sphi %s612_s17, %s737_s17   ;;  %s562_s16 = sphi %s610_s16, %s736_s16   ;;  %s558_s15 = sphi %s608_s15, %s735_s15   ;;  %s554_s14 = sphi %s606_s14, %s734_s14   ;;  %s550_s13 = sphi %s604_s13, %s733_s13   ;;  %s546_s12 = sphi %s602_s12, %s732_s12  }
   0x6   : > { %p26_p0 = scmp.ge.s32.totalorder %s25_s21, 2  ;;  %s28_s22 = sadd.s32 1, %s570_s18 }
   0x7   : > { %s37_s23 = sadd.s32 1, %s554_s14  ;;  %p44_p1 = scmp.ne.s32.totalorder %s554_s14, %s550_s13 }
   0x8   : > { %s740_s21 = smov (%p26_p0, %s25_s21), 0  ;;  %s742_s22 = smov (!%p26_p0, %s28_s22), %s570_s18 }
   0x9   : > { %s33_s24 = ssub.s32 %s566_s17, %s740_s21  ;;  %p45_p2 = scmp.eq.s32.totalorder %s574_s19, 0 }
   0xa   : > { %p30_p3 = scmp.ge.s32.totalorder %s742_s22, 2  ;;  %p50_p4 = scmp.ne.s32.totalorder %s550_s13, %s546_s12 }
   0xb   : > { %p653_p5 = por %p45_p2, %p44_p1  ;;  %p51_p6 = scmp.eq.s32.totalorder %s383_s20, 0 }
   0xc   : > { %s744_s22 = smov (%p30_p3, %s742_s22), 0  ;;  %p402_p8 = scmp.lt.s32.totalorder %s574_s19, 4 }
   0xd   : > { %p659_p7 = por %p51_p6, %p50_p4  ;;  %s32_s27 = ssub.s32 %s570_s18, %s744_s22 }
   0xe   : > { %s34_s28 = sor.u32 %s33_s24, %s32_s27  ;;  %s150_s29 = sand.u32 1, %s554_s14  }
   0xf   : > { %p35_p9 = scmp.eq.s32.totalorder %s34_s28, 0  ;;  %s387_s30 = sshll.u32 %s150_s29, 4 }
  0x10   : > { %s388_s4 = sshll.u32 %s570_s18, 2  ;;  %s154_s8 = scalar_lea.vmem [#allocation2], %s387_s30 }
  0x11   : > { %s669_s5 = scalar_select %p35_p9, %s554_s14, %s37_s23  }
  0x12   : > { %s158_s6 = sadd.s32 %s566_s17, %s388_s4  ;;  %s163_s9 = sshll.u32 %s154_s8, 4  ;;  %s164_s9 = int_to_ptr.vmem [resolvable:$true] %s163_s9 }
  0x13   : > { %s389_s7 = sshll.u32 %s158_s6, 3  ;;  %p399_p10 = pnand %p402_p8, %p653_p5 }
  0x14   : > { %s160_s12 = scalar_lea.hbm %s726_s0, %s389_s7  ;;  %p390_p11 = scmp.ge.s32.totalorder %s574_s19, 1 }
  0x15   : > { %s161_s20 = sshll.u32 %s160_s12, 4  ;;  %s151_s24 = scalar_lea.sflag [#allocation3], %s150_s29  ;;  %s162_s20 = int_to_ptr.hbm [resolvable:$true] %s161_s20 }
  0x16   : > { %s576_s27 = smov 256   ;;  %s577_s23 = smov 128  }
  0x17   : > { %s578_s28 = smov 8   ;;  %p171_p12 = scmp.lt.s32.totalorder %s574_s19, 5 }
  0x18   : > { %401 = dma.hbm_to_vmem [thread:$0]  (!%p399_p10), %s162_s20, 256, %s164_s9, %s151_s24, %s576_s27, %s577_s23, %s578_s28  }
  0x19   : > { %p172_p13 = pnand %p390_p11, %p171_p12 }
  0x1a   : > { %s177_s30 = sand.u32 (!%p172_p13), 1, %s550_s13  }
  0x1b   : > { %175 = sbr.rel (%p172_p13) target bundleno = 193 (0xc1), region = 32  ;;  %s391_s4 = sshll.u32 (!%p172_p13), %s177_s30, 4 }
  0x1c   : > { %s178_s6 = scalar_lea.sflag (!%p172_p13), [#allocation3], %s177_s30  ;;  %s181_s7 = scalar_lea.vmem (!%p172_p13), [#allocation2], %s391_s4 }
  0x20   : > { %541 = dma.done.wait (%p659_p7), %s178_s6, 256  }
  0x21   : > { %543 = vsyncadd (%p659_p7), %s178_s6, 4294967040  ;;  %v579_v0 = vmov 1   ;;  %v580_v1 = vmov 0   ;;  %v581_v2 = vmov 2   ;;  %v218_v3 = vld [vmem:[%s727_s1] sm:$0xff]  ;;  %v219_v4 = vld [vmem:[%s727_s1 + $0x8] sm:$0xff] }
  0x22   : > { %474 = vset.pattern.permute.xlu1 %v579_v0  ;;  %473 = vset.pattern.permute.xlu0 %v580_v1  ;;  %v277_v5 = vld [vmem:[%s728_s2] sm:$0x7]  ;;  %v217_v9 = vld [vmem:[%s181_s7 + $0x8] sm:$0xff]  ;;  %p208_p0 = scmp.lt.s32.totalorder %s562_s16, 1  ;;  %vm273_vm0 = vcmask 1040384   ;;  %vm275_vm1 = vcmask 1041408  }
  0x23   : > { %475 = vset.pattern.permute.xlu2 %v581_v2  ;;  %240 = vperm.xlu1 %474, %v218_v3   ;;  %v216_v7 = vld [vmem:[%s181_s7] sm:$0xff]  ;;  %p210_p1 = scmp.lt.s32.totalorder %s558_s15, 1 }
  0x24   : > { %222 = vperm.xlu0 %473, %v218_v3   ;;  %257 = vperm.xlu2 %475, %v218_v3   ;;  %s746_s16 = smov (!%p208_p0, %s562_s16), 1 }
  0x25   : > { %s748_s15 = smov (!%p210_p1, %s558_s15), 1  ;;  %s392_s11 = sshll.u32 %s746_s16, 1 }
  0x26   : > { %s213_s12 = sadd.s32 %s392_s11, %s748_s15 }
  0x27   : > { %s393_s20 = sshll.u32 %s213_s12, 2 }
  0x28   : > { %s215_s23 = scalar_lea.vmem %s729_s3, %s393_s20 }
  0x2b   : > { %244 = vperm.xlu1 %474, %v219_v4  }
  0x2c   : > { %227 = vperm.xlu0 %473, %v219_v4   ;;  %261 = vperm.xlu2 %475, %v219_v4  }
  0x34   : > { %280 = vperm.xlu0 %473, %v277_v5  }
  0x7e   : > { %v258_v6 = vpop.permute.xlu2 %257 }
  0x7f   : > { %v264_v10 = vmul.f32 %v258_v6, %v216_v7 }
  0x86   : > { %v262_v8 = vpop.permute.xlu2 %261 }
  0x87   : > { %v265_v11 = vmul.f32 %v262_v8, %v217_v9 }
  0x89   : > { %v266_v12 = vadd.f32 %v265_v11, %v264_v10 }
  0x8b   : > { %v267_v15 = vrot.slane %v266_v12, 4 }
  0x8d   : > { %v268_v16 = vadd.f32 %v267_v15, %v266_v12 }
  0x8f   : > { %v269_v25 = vrot.slane %v268_v16, 2 }
  0x91   : > { %v270_v30 = vadd.f32 %v269_v25, %v268_v16 }
  0x93   : > { %v271_v35 = vrot.slane %v270_v30, 1 }
  0x95   : > { %v241_v13 = vpop.permute.xlu1 %240  ;;  %v272_v40 = vadd.f32 %v271_v35, %v270_v30 }
  0x96   : > { %v223_v14 = vpop.permute.xlu0 %222  ;;  %v247_v19 = vmul.f32 %v241_v13, %v216_v7 }
  0x97   : > { %v230_v20 = vmul.f32 %v223_v14, %v216_v7 }
  0x9d   : > { %v245_v17 = vpop.permute.xlu1 %244 }
  0x9e   : > { %v228_v18 = vpop.permute.xlu0 %227  ;;  %v248_v21 = vmul.f32 %v245_v17, %v217_v9 }
  0x9f   : > { %v231_v22 = vmul.f32 %v228_v18, %v217_v9 }
  0xa0   : > { %v249_v23 = vadd.f32 %v248_v21, %v247_v19 }
  0xa1   : > { %v232_v24 = vadd.f32 %v231_v22, %v230_v20 }
  0xa2   : > { %v250_v26 = vrot.slane %v249_v23, 4 }
  0xa3   : > { %v233_v27 = vrot.slane %v232_v24, 4 }
  0xa4   : > { %v251_v28 = vadd.f32 %v250_v26, %v249_v23 }
  0xa5   : > { %v234_v29 = vadd.f32 %v233_v27, %v232_v24 }
  0xa6   : > { %v252_v31 = vrot.slane %v251_v28, 2  ;;  %v281_v42 = vpop.permute.xlu0 %280 }
  0xa7   : > { %v235_v32 = vrot.slane %v234_v29, 2 }
  0xa8   : > { %v253_v33 = vadd.f32 %v252_v31, %v251_v28 }
  0xa9   : > { %v236_v34 = vadd.f32 %v235_v32, %v234_v29 }
  0xaa   : > { %v254_v36 = vrot.slane %v253_v33, 1 }
  0xab   : > { %v237_v37 = vrot.slane %v236_v34, 1 }
  0xac   : > { %v255_v39 = vadd.f32 %v254_v36, %v253_v33 }
  0xad   : > { %v238_v38 = vadd.f32 %v237_v37, %v236_v34 }
  0xaf   : > { %v274_v41 = vsel %vm273_vm0, %v238_v38, %v255_v39 }
  0xb0   : > { %v276_v43 = vsel %vm275_vm1, %v274_v41, %v272_v40 }
  0xb1   : > { %v283_v44 = vadd.f32 %v281_v42, %v276_v43 }
  0xb3   : > { %v284_v45 = vmax.f32 %v283_v44, 0.0 }
  0xb5   : > { %476 = vtanh.f32 %v284_v45 }
  0xbb   : > { %v477_v46 = vpop.eup %476 }
  0xbc   : > { %v286_v47 = vmul.f32 0.5, %v477_v46 }
  0xbe   : > { %v287_v48 = vadd.f32 0.5, %v286_v47 }
  0xc0   : > { %288 = vst [vmem:[%s215_s23] sm:$0x7] %v287_v48 }
  0xc1 PF: > { %s16_s19 = sadd.s32 1, %s574_s19   ;;  %s732_s12 = smov %s550_s13 }
  0xc2   : > { %p13_p2 = scmp.ge.s32.totalorder %s16_s19, 6   ;;  %s733_s13 = smov %s554_s14 }
  0xc3   : > { %s734_s14 = smov %s669_s5  ;;  %s735_s15 = smov %s566_s17 }
  0xc4   : > { %s736_s16 = smov %s570_s18  ;;  %s737_s17 = smov %s740_s21 }
  0xc5   : > { %s738_s18 = smov %s744_s22  ;;  %15 = sbr.rel (!%p13_p2) target bundleno = 5 (0x5), region = 72 }
  0xca   :  { %316 = vsyncpa [#allocation3], 1 }
  0xcb   :  { %318 = vsyncpa [#allocation3 + $0x1], 1 }

</bundles_post_ra>
